<compile_context>
chip_gen: v7x
topology: tpu7x:2x2x1
jax: 0.10.0
libtpu: 0.0.40
codegen_flags: <defaults>
</compile_context>

<pallas_src>
import functools

import jax
import jax.numpy as jnp
from jax import lax
from jax.experimental import pallas as pl
from jax.experimental.pallas import tpu as pltpu

# Optional bf16 MXU operands (mainly a v5e lever, where f32 matmul throughput is
# low). Off by default: extra precision loss vs. the f64 reference.
_USE_BF16_MXU = False


def _round_up(x, m):
    return ((x + m - 1) // m) * m


def _cdiv(a, b):
    return -(-a // b)


# ---------------------------------------------------------------------------
# Generation-aware tile / VMEM planning
# ---------------------------------------------------------------------------
def _small_vmem_chip():
    """True for v7x-like chips (64 MiB VMEM per TensorCore)."""
    try:
        kind = jax.devices()[0].device_kind.lower()
        if "v7" in kind:
            return True
        if "v6" in kind or "v5" in kind or "v4" in kind:
            return False
    except Exception:
        pass
    try:
        info = pltpu.get_tpu_info()
        cap = getattr(info, "vmem_capacity_bytes", None)
        if cap:
            return int(cap) <= 80 * 1024 * 1024
    except Exception:
        pass
    return True  # conservative fallback: small-VMEM tiling is safe everywhere


def _kernel_plan(C):
    """Per-kernel (tile_target, vmem_limit) based on chip generation and C."""
    if _small_vmem_chip():
        # v7x: 64 MiB VMEM per TC. Stats streams one input; blend streams 3.
        stats_target, blend_target = 8192, 2048
        stats_vmem, blend_vmem = 40 << 20, 36 << 20
    else:
        # v5e / v6e (128 MiB VMEM): big tiles to amortize grid-step overhead.
        stats_target, blend_target = 8192, 4096
        stats_vmem, blend_vmem = 72 << 20, 72 << 20

    def shrink(target, budget, n_streams):
        # Keep double-buffered f32 streams + resident CxC blocks within budget.
        resident = 2 * C * C * 4 + (4 << 20)          # accumulators/W + slack
        per_col = n_streams * 2 * C * 4               # double-buffered columns
        t = max(128, ((budget - resident) // per_col) // 128 * 128)
        return min(target, t)

    return (shrink(stats_target, stats_vmem, 1), stats_vmem,
            shrink(blend_target, blend_vmem, 3), blend_vmem)


def _split_plan(n, target):
    """(tile_n, n_split, steps_per_split) with minimal padding, tile_n % 128 == 0."""
    if n <= target:
        return _round_up(n, 128), 1, 1
    k = _cdiv(n, target)
    if k % 2:
        k += 1                                        # even -> both cores busy
    tn = _round_up(_cdiv(n, k), 128)
    k = _cdiv(n, tn)
    if k % 2:
        k += 1
    return tn, 2, k // 2


def _tile_1d(n, target):
    if n <= target:
        return _round_up(n, 128)
    return _round_up(_cdiv(n, _cdiv(n, target)), 128)


def _pad_cols_zero(a, n_pad):
    C, N = a.shape
    if n_pad == N:
        return a
    return jnp.pad(a, ((0, 0), (0, n_pad - N)))


def _flatten(a, C):
    a2 = a.reshape(C, -1)
    if a2.dtype in (jnp.bfloat16, jnp.float32):
        return a2                                     # keep bf16 streams narrow
    return a2.astype(jnp.float32)


# ---------------------------------------------------------------------------
# Kernel A: streaming pilot-shifted sufficient statistics
#   g = f - pilot ; accumulate sum(g) and g @ g^T per core, finalize in JAX:
#   mean = pilot + sum(g)/N ; cov = (G - sum(g) sum(g)^T / N) / (N - 1)
# ---------------------------------------------------------------------------
def _stats_kernel(pilot_ref, f_ref, sum_ref, gram_ref, *, use_bf16):
    i = pl.program_id(1)

    @pl.when(i == 0)
    def _():
        sum_ref[...] = jnp.zeros_like(sum_ref)
        gram_ref[...] = jnp.zeros_like(gram_ref)

    g = f_ref[...].astype(jnp.float32) - pilot_ref[...]        # (C, TN)
    sum_ref[...] += jnp.sum(g, axis=1, keepdims=True)          # (1,C,1)+(C,1)
    gm = g.astype(jnp.bfloat16) if use_bf16 else g
    # sum(g g^T): contract the N axis of both operands on the MXU directly
    # (no explicit transpose of the (C, TN) tile).
    gram_ref[...] += lax.dot_general(
        gm, gm, (((1,), (1,)), ((), ())),
        preferred_element_type=jnp.float32)                    # (1,C,C)+(C,C)


def feature_stats(f_raw, tn_target, vmem_limit):
    """f_raw: (C, N) f32/bf16 -> (mean (C,1) f32, cov (C,C) f32)."""
    C, N = f_raw.shape
    pilot = jnp.mean(f_raw[:, : min(128, N)].astype(jnp.float32),
                     axis=1, keepdims=True)
    # Quantize pilot to the input dtype so pilot-padded columns are *exactly*
    # neutral (g == 0) even for bf16 inputs.
    pilot = pilot.astype(f_raw.dtype).astype(jnp.float32)

    tn, n_split, steps = _split_plan(N, tn_target)
    n_pad = n_split * steps * tn
    if n_pad != N:
        pad = jnp.broadcast_to(pilot.astype(f_raw.dtype), (C, n_pad - N))
        f = jnp.concatenate([f_raw, pad], axis=1)
    else:
        f = f_raw

    kern = functools.partial(_stats_kernel, use_bf16=_USE_BF16_MXU)
    partial_sum, partial_gram = pl.pallas_call(
        kern,
        grid=(n_split, steps),
        out_shape=(
            jax.ShapeDtypeStruct((n_split, C, 1), jnp.float32),
            jax.ShapeDtypeStruct((n_split, C, C), jnp.float32),
        ),
        in_specs=[
            pl.BlockSpec((C, 1), lambda c, i: (0, 0)),           # pilot (resident)
            pl.BlockSpec((C, tn), lambda c, i: (0, c * steps + i)),
        ],
        out_specs=(
            pl.BlockSpec((1, C, 1), lambda c, i: (c, 0, 0)),     # per-core accum
            pl.BlockSpec((1, C, C), lambda c, i: (c, 0, 0)),     # per-core accum
        ),
        compiler_params=pltpu.CompilerParams(
            dimension_semantics=("parallel", "arbitrary"),
            vmem_limit_bytes=vmem_limit),
        cost_estimate=pl.CostEstimate(
            flops=2 * C * C * n_pad + 3 * C * n_pad,
            transcendentals=0,
            bytes_accessed=C * n_pad * f.dtype.itemsize
                           + n_split * (C * C + C) * 4 + C * 4),
    )(pilot, f)

    # Tiny combine + finalize in plain JAX (works for any n_split).
    s_g = jnp.sum(partial_sum, axis=0)                           # (C, 1)
    gram = jnp.sum(partial_gram, axis=0)                         # (C, C)
    mean = pilot + s_g / N
    denom = float(max(N - 1, 1))
    cov = (gram - (s_g @ s_g.T) / N) / denom
    return mean, cov


# ---------------------------------------------------------------------------
# Kernel B: fused whiten+color+mean-add+alpha-blend, streaming over N tiles.
#   t   = W @ f + b    where  W = W_color @ W_white,  b = s_mean - W @ c_mean
#   out = alpha * t + (1 - alpha) * x
# ---------------------------------------------------------------------------
def _blend_kernel(w_ref, b_ref, f_ref, x_ref, out_ref, *, alpha, use_bf16):
    w = w_ref[...]
    f = f_ref[...]
    if use_bf16:
        w = w.astype(jnp.bfloat16)
        f = f.astype(jnp.bfloat16)
    else:
        f = f.astype(jnp.float32)
    t = jnp.dot(w, f, preferred_element_type=jnp.float32) + b_ref[...]
    out_ref[...] = alpha * t + (1.0 - alpha) * x_ref[...].astype(jnp.float32)


def wct_blend(w, b, f_raw, x_raw, alpha, tn_target, vmem_limit):
    C, N = f_raw.shape
    tn = _tile_1d(N, tn_target)
    n_pad = _round_up(N, tn)
    f = _pad_cols_zero(f_raw, n_pad)
    x = _pad_cols_zero(x_raw, n_pad)

    kern = functools.partial(_blend_kernel, alpha=float(alpha),
                             use_bf16=_USE_BF16_MXU)
    out = pl.pallas_call(
        kern,
        grid=(n_pad // tn,),
        out_shape=jax.ShapeDtypeStruct((C, n_pad), jnp.float32),
        in_specs=[
            pl.BlockSpec((C, C), lambda i: (0, 0)),     # fused W (resident)
            pl.BlockSpec((C, 1), lambda i: (0, 0)),     # fused bias (resident)
            pl.BlockSpec((C, tn), lambda i: (0, i)),    # raw content features
            pl.BlockSpec((C, tn), lambda i: (0, i)),    # x (flattened)
        ],
        out_specs=pl.BlockSpec((C, tn), lambda i: (0, i)),
        compiler_params=pltpu.CompilerParams(
            dimension_semantics=("parallel",),          # independent N tiles
            vmem_limit_bytes=vmem_limit),
        cost_estimate=pl.CostEstimate(
            flops=2 * C * C * n_pad + 4 * C * n_pad,
            transcendentals=0,
            bytes_accessed=(f.dtype.itemsize + x.dtype.itemsize + 4) * C * n_pad
                           + (C * C + C) * 4),
    )(w, b, f, x)
    return out[:, :N]


# ---------------------------------------------------------------------------
# Module-equivalent forward (WCT.forward)
# ---------------------------------------------------------------------------
def wct_forward(c, s, x, alpha=0.7):
    cb, cc, ch, cw = c.shape
    sb, sc, sh, sw = s.shape
    assert cb == 1 and sb == 1, "reference module squeezes a batch of 1"

    cF = _flatten(c, cc)
    sF = _flatten(s, sc)
    xF = _flatten(x, cc)

    stats_tn, stats_vmem, blend_tn, blend_vmem = _kernel_plan(cc)

    # Pallas kernel A: mean + covariance in one streaming pass each; centered
    # features are never materialized (centering folded into kernel B's bias).
    c_mean, c_cov = feature_stats(cF, stats_tn, stats_vmem)
    s_mean, s_cov = feature_stats(sF, stats_tn, stats_vmem)

    # contentConv gets +I (as in the reference); styleConv does not.
    c_cov = c_cov + jnp.eye(cc, dtype=jnp.float32)

    # Symmetric-PSD eigendecomposition (batched) replaces the full SVD; it is
    # the dominant end-to-end cost and eigh is several-fold cheaper.
    # TODO(synk): reference uses float64 torch.svd; TPU has no f64, f32 eigh used.
    evals, evecs = jnp.linalg.eigh(jnp.stack([c_cov, s_cov]))
    c_e, s_e = evals[0], evals[1]
    c_v, s_v = evecs[0], evecs[1]

    # Value-threshold mask replaces the "break at first eigenvalue < 1e-5" loop
    # (equivalent for sorted spectra; works regardless of eigh's ordering).
    c_d = jnp.where(c_e >= 1e-5, lax.rsqrt(jnp.maximum(c_e, 1e-5)), 0.0)
    s_d = jnp.where(s_e >= 1e-5, jnp.sqrt(jnp.maximum(s_e, 0.0)), 0.0)

    # Tiny CxC algebra in plain JAX: fuse whitening and coloring into one matrix
    # W; fold content-mean subtraction + style-mean addition into one bias.
    w_white = jnp.dot(c_v * c_d[None, :], c_v.T)
    w_color = jnp.dot(s_v * s_d[None, :], s_v.T)
    w = jnp.dot(w_color, w_white)                     # (C, C)
    bias = s_mean - jnp.dot(w, c_mean)                # (C, 1)

    # Pallas kernel B: single streaming matmul + alpha blend over N tiles.
    out_flat = wct_blend(w, bias, cF, xF, alpha, blend_tn, blend_vmem)
    return out_flat.reshape(x.shape).astype(jnp.float32)


# ---------------------------------------------------------------------------
# Pure-JAX reference (float32) for a sanity check.
# ---------------------------------------------------------------------------
def _wct_reference(c, s, x, alpha):
    hp = lax.Precision.HIGHEST
    cc = c.shape[1]
    cF = c.reshape(cc, -1).astype(jnp.float32)
    sF = s.reshape(s.shape[1], -1).astype(jnp.float32)

    def stats(F, add_eye):
        mean = jnp.mean(F, axis=1, keepdims=True)
        Fc = F - mean
        cov = jnp.dot(Fc, Fc.T, precision=hp) / (F.shape[1] - 1)
        if add_eye:
            cov = cov + jnp.eye(F.shape[0], dtype=jnp.float32)
        return mean, Fc, cov

    c_mean, cFc, c_cov = stats(cF, True)
    s_mean, _, s_cov = stats(sF, False)
    c_e, c_v = jnp.linalg.eigh(c_cov)
    s_e, s_v = jnp.linalg.eigh(s_cov)
    c_d = jnp.where(c_e >= 1e-5, 1.0 / jnp.sqrt(jnp.maximum(c_e, 1e-5)), 0.0)
    s_d = jnp.where(s_e >= 1e-5, jnp.sqrt(jnp.maximum(s_e, 0.0)), 0.0)
    ww = jnp.dot(c_v * c_d[None, :], c_v.T, precision=hp)
    wc = jnp.dot(s_v * s_d[None, :], s_v.T, precision=hp)
    target = jnp.dot(wc, jnp.dot(ww, cFc, precision=hp), precision=hp) + s_mean
    out = alpha * target.reshape(x.shape) + (1.0 - alpha) * x.astype(jnp.float32)
    return out.astype(jnp.float32)


if __name__ == "__main__":
    key = jax.random.PRNGKey(0)
    kc, ks, kx = jax.random.split(key, 3)
    # batch=1 (required by the module's squeeze), small channel count; spatial
    # sizes chosen so N is not a multiple of 128 -> exercises padding and the
    # 2-way split of the stats reduction.
    c = jax.random.normal(kc, (1, 16, 100, 125), dtype=jnp.float32)
    s = jax.random.normal(ks, (1, 16, 90, 110), dtype=jnp.float32) * 0.5 + 1.0
    x = jax.random.normal(kx, (1, 16, 100, 125), dtype=jnp.float32)

    out = wct_forward(c, s, x, alpha=0.7)
    jax.block_until_ready(out)

    assert out.shape == x.shape, out.shape
    assert out.dtype == jnp.float32, out.dtype
    assert bool(jnp.all(jnp.isfinite(out))), "non-finite output"

    ref = _wct_reference(c, s, x, 0.7)
    jax.block_until_ready(ref)
    assert bool(jnp.allclose(out, ref, rtol=5e-2, atol=5e-2)), (
        "mismatch vs pure-JAX reference: max abs diff = "
        f"{float(jnp.max(jnp.abs(out - ref)))}")

    print("KERNEL_OK")
</pallas_src>

<mosaic_0001>
module attributes {stable_mosaic.version = 11 : i64} {
  func.func @_stats_kernel(%arg0: i32, %arg1: i32, %arg2: memref<16x1xf32, #tpu.memory_space<vmem>>, %arg3: memref<16x6272xf32, #tpu.memory_space<vmem>>, %arg4: memref<1x16x1xf32, #tpu.memory_space<vmem>>, %arg5: memref<1x16x16xf32, #tpu.memory_space<vmem>>) attributes {dimension_semantics = [#tpu.dimension_semantics<parallel>, #tpu.dimension_semantics<arbitrary>], iteration_bounds = array<i64: 2, 1>, scalar_prefetch = 0 : i64, scratch_operands = 0 : i64, tpu.core_type = #tpu.core_type<tc>, window_params = [{pipeline_mode = #tpu.pipeline_mode<synchronous>, transform_indices = @transform_0, window_bounds = array<i64: 16, 1>}, {transform_indices = @transform_1, window_bounds = array<i64: 16, 6272>}, {transform_indices = @transform_2, window_bounds = array<i64: 1, 16, 1>}, {transform_indices = @transform_3, window_bounds = array<i64: 1, 16, 16>}]} {
    %c0_i32 = arith.constant 0 : i32
    %0 = arith.cmpi eq, %arg1, %c0_i32 : i32
    %1 = arith.extui %0 : i1 to i32
    %c0_i32_0 = arith.constant 0 : i32
    %2 = arith.cmpi ne, %1, %c0_i32_0 : i32
    scf.if %2 {
      %cst_17 = arith.constant 0.000000e+00 : f32
      %18 = vector.broadcast %cst_17 : f32 to vector<1x16x1xf32>
      %c0_18 = arith.constant 0 : index
      %c0_19 = arith.constant 0 : index
      %c0_20 = arith.constant 0 : index
      %19 = vector.load %arg4[%c0_18, %c0_19, %c0_20] : memref<1x16x1xf32, #tpu.memory_space<vmem>>, vector<1x16x1xf32>
      tpu.vector_store %arg4[%c0_18, %c0_19, %c0_20], %18 {strides = array<i32>} : memref<1x16x1xf32, #tpu.memory_space<vmem>>, vector<1x16x1xf32>,
      %cst_21 = arith.constant 0.000000e+00 : f32
      %20 = vector.broadcast %cst_21 : f32 to vector<1x16x16xf32>
      %c0_22 = arith.constant 0 : index
      %c0_23 = arith.constant 0 : index
      %c0_24 = arith.constant 0 : index
      %21 = vector.load %arg5[%c0_22, %c0_23, %c0_24] : memref<1x16x16xf32, #tpu.memory_space<vmem>>, vector<1x16x16xf32>
      tpu.vector_store %arg5[%c0_22, %c0_23, %c0_24], %20 {strides = array<i32>} : memref<1x16x16xf32, #tpu.memory_space<vmem>>, vector<1x16x16xf32>,
    } else {
    }
    %c0 = arith.constant 0 : index
    %c0_1 = arith.constant 0 : index
    %3 = vector.load %arg3[%c0, %c0_1] : memref<16x6272xf32, #tpu.memory_space<vmem>>, vector<16x6272xf32>
    %c0_2 = arith.constant 0 : index
    %c0_3 = arith.constant 0 : index
    %4 = vector.load %arg2[%c0_2, %c0_3] : memref<16x1xf32, #tpu.memory_space<vmem>>, vector<16x1xf32>
    %5 = vector.broadcast %4 : vector<16x1xf32> to vector<16x6272xf32>
    %6 = arith.subf %3, %5 : vector<16x6272xf32>
    %c0_4 = arith.constant 0 : index
    %c0_5 = arith.constant 0 : index
    %c0_6 = arith.constant 0 : index
    %7 = vector.load %arg4[%c0_4, %c0_5, %c0_6] : memref<1x16x1xf32, #tpu.memory_space<vmem>>, vector<1x16x1xf32>
    %cst = arith.constant dense<0.000000e+00> : vector<16xf32>
    %8 = vector.multi_reduction <add>, %6, %cst [1] : vector<16x6272xf32> to vector<16xf32>
    %9 = vector.shape_cast %8 : vector<16xf32> to vector<16x1xf32>
    %10 = vector.shape_cast %9 : vector<16x1xf32> to vector<1x16x1xf32>
    %11 = arith.addf %7, %10 : vector<1x16x1xf32>
    %c0_7 = arith.constant 0 : index
    %c0_8 = arith.constant 0 : index
    %c0_9 = arith.constant 0 : index
    %12 = vector.load %arg4[%c0_7, %c0_8, %c0_9] : memref<1x16x1xf32, #tpu.memory_space<vmem>>, vector<1x16x1xf32>
    tpu.vector_store %arg4[%c0_7, %c0_8, %c0_9], %11 {strides = array<i32>} : memref<1x16x1xf32, #tpu.memory_space<vmem>>, vector<1x16x1xf32>,
    %c0_10 = arith.constant 0 : index
    %c0_11 = arith.constant 0 : index
    %c0_12 = arith.constant 0 : index
    %13 = vector.load %arg5[%c0_10, %c0_11, %c0_12] : memref<1x16x16xf32, #tpu.memory_space<vmem>>, vector<1x16x16xf32>
    %cst_13 = arith.constant dense<0.000000e+00> : vector<16x16xf32>
    %14 = tpu.matmul %6, %6, %cst_13 {dimension_numbers = #tpu.dot_dimension_numbers<[1], [1], [0], [0], [0, 0, 1, 0], [], []>} : vector<16x6272xf32>, vector<16x6272xf32>, vector<16x16xf32> -> vector<16x16xf32>
    %15 = vector.shape_cast %14 : vector<16x16xf32> to vector<1x16x16xf32>
    %16 = arith.addf %13, %15 : vector<1x16x16xf32>
    %c0_14 = arith.constant 0 : index
    %c0_15 = arith.constant 0 : index
    %c0_16 = arith.constant 0 : index
    %17 = vector.load %arg5[%c0_14, %c0_15, %c0_16] : memref<1x16x16xf32, #tpu.memory_space<vmem>>, vector<1x16x16xf32>
    tpu.vector_store %arg5[%c0_14, %c0_15, %c0_16], %16 {strides = array<i32>} : memref<1x16x16xf32, #tpu.memory_space<vmem>>, vector<1x16x16xf32>,
    return
  }
  func.func @transform_0(%arg0: i32, %arg1: i32) -> (i32, i32) {
    %c0_i32 = arith.constant 0 : i32
    %c0_i32_0 = arith.constant 0 : i32
    %c0_i32_1 = arith.constant 0 : i32
    return %c0_i32, %c0_i32_0 : i32, i32
  }
  func.func @transform_1(%arg0: i32, %arg1: i32) -> (i32, i32) {
    %c1_i32 = arith.constant 1 : i32
    %0 = arith.muli %arg0, %c1_i32 : i32
    %1 = arith.addi %0, %arg1 : i32
    %c0_i32 = arith.constant 0 : i32
    %c0_i32_0 = arith.constant 0 : i32
    return %c0_i32, %1 : i32, i32
  }
  func.func @transform_2(%arg0: i32, %arg1: i32) -> (i32, i32, i32) {
    %c0_i32 = arith.constant 0 : i32
    %c0_i32_0 = arith.constant 0 : i32
    %c0_i32_1 = arith.constant 0 : i32
    return %arg0, %c0_i32, %c0_i32_0 : i32, i32, i32
  }
  func.func @transform_3(%arg0: i32, %arg1: i32) -> (i32, i32, i32) {
    %c0_i32 = arith.constant 0 : i32
    %c0_i32_0 = arith.constant 0 : i32
    %c0_i32_1 = arith.constant 0 : i32
    return %arg0, %c0_i32, %c0_i32_0 : i32, i32, i32
  }
}

</mosaic_0001>

<bundles_post_ra>
// kernel: tpu_custom_call.1
= control target key start
LH: loop header
LB: loop body
LE: loop exit
PB: predicated region body
PF: predicated region fallthrough
CT: control target
= control target key end

     0   :  { %9 = vsyncpa [#allocation3], 0  ;;  %s3900_s0 = inlined_call_operand.vmem [shape: f32[16,1], index: 0, kind: input, shape index: {}]   ;;  %s3901_s1 = inlined_call_operand.hbm [shape: f32[16,12544], index: 1, kind: input, shape index: {}]   ;;  %s3902_s2 = inlined_call_operand.vmem [shape: f32[2,16,1], index: 2, kind: output, shape index: {0}]   ;;  %s3903_s3 = inlined_call_operand.hbm [shape: f32[2,16,16], index: 3, kind: output, shape index: {1}]  }
   0x1   :  { %11 = vsyncpa [#allocation3 + $0x1], 0 }
   0x2   :  { %12 = vsyncpa [#allocation4], 0 }
   0x3   :  { %14 = vsyncpa [#allocation4 + $0x1], 0  ;;  %s2988_s12 = smov 0   ;;  %s2990_s13 = smov 0  }
   0x4   :  { %s2992_s14 = smov 0   ;;  %s2994_s15 = smov 0  }
   0x5   :  { %s2996_s16 = smov 0   ;;  %s2998_s17 = smov 0  }
   0x6 LB: > { %s2555_s18 = sadd.s32 4294967295, %s2957_s17   ;;  %s2556_s19 = sadd.s32 4294967294, %s2957_s17   ;;  %s2957_s17 = sphi %s2998_s17, %s20_s17   ;;  %s2953_s16 = sphi %s2996_s16, %s4011_s16   ;;  %s2949_s15 = sphi %s2994_s15, %s4010_s15   ;;  %s2945_s14 = sphi %s2992_s14, %s4009_s14   ;;  %s2941_s13 = sphi %s2990_s13, %s4008_s13   ;;  %s2937_s12 = sphi %s2988_s12, %s4007_s12  }
   0x7   : > { %s32_s20 = sadd.s32 1, %s2953_s16  ;;  %s62_s21 = sadd.s32 1, %s2945_s14 }
   0x8   : > { %p34_p0 = scmp.ge.s32.totalorder %s32_s20, 2  ;;  %p69_p1 = scmp.ne.s32.totalorder %s2945_s14, %s2941_s13 }
   0x9   : > { %p70_p2 = scmp.eq.s32.totalorder %s2957_s17, 0  ;;  %p75_p3 = scmp.ne.s32.totalorder %s2941_s13, %s2937_s12 }
   0xa   : > { %s4013_s20 = smov (%p34_p0, %s32_s20), 0  ;;  %p76_p5 = scmp.eq.s32.totalorder %s2555_s18, 0 }
   0xb   : > { %p3029_p4 = por %p70_p2, %p69_p1  ;;  %s59_s23 = ssub.s32 %s2953_s16, %s4013_s20 }
   0xc   : > { %p125_p6 = scmp.eq.s32.totalorder %s2555_s18, 1  ;;  %p60_p7 = scmp.eq.s32.totalorder %s59_s23, 0 }
   0xd   : > { %p3035_p8 = por %p76_p5, %p75_p3  ;;  %p131_p10 = scmp.eq.s32.totalorder %s2556_s19, 1 }
   0xe   : > { %p3039_p9 = por %p125_p6, %p69_p1  ;;  %p2787_p13 = scmp.lt.s32.totalorder %s2957_s17, 2 }
   0xf   : > { %s3044_s26 = scalar_select %p60_p7, %s2945_s14, %s62_s21  }
  0x10   : > { %s3948_s25 = scalar_select %p3039_p9, 1, 0 }
  0x11   : > { %p3046_p11 = por %p131_p10, %p75_p3  ;;  %s154_s28 = sand.u32 1, %s2945_s14  }
  0x12   : > { %s2773_s29 = smul.u32 784, %s154_s28  ;;  %p3056_p0 = pnand %p2787_p13, %p3029_p4 }
  0x13   : > { %s3949_s27 = scalar_select %p3046_p11, 1, 0 }
  0x14   : > { %s2569_s30 = smul.u32 6272, %s2953_s16  ;;  %s158_s8 = scalar_lea.vmem [#allocation2], %s2773_s29 }
  0x15   : > { %s166_s9 = sshll.u32 %s158_s8, 4  ;;  %s3067_s10 = scalar_lea.sflag [#allocation3], %s154_s28  ;;  %s3065_s9 = int_to_ptr.vmem [resolvable:$true] %s166_s9 }
  0x16   : > { %s3063_s7 = scalar_lea.hbm %s3901_s1, %s2569_s30  ;;  %p2847_p2 = pneg %p3056_p0 }
  0x17   : > { %s2845_s11 = scalar_lea.hbm %s3063_s7, 12544  ;;  %s2850_s21 = scalar_lea.hbm %s3901_s1, 25088 }
  0x18   : > { %p2846_p1 = scmp.ne.s32.totalorder %s3063_s7, %s2845_s11  ;;  %p2851_p5 = scmp.lt.u32.totalorder %s3063_s7, %s3901_s1 }
  0x19   : > { %p2852_p6 = scmp.lt.u32.totalorder %s2850_s21, %s2845_s11  ;;  %p2854_p10 = scmp.lt.u32.totalorder %s2845_s11, %s3063_s7 }
  0x1a   : > { %p2848_p3 = pnand %p2847_p2, %p2846_p1 }
  0x1b   : > { %p2853_p7 = por %p2852_p6, %p2851_p5 }
  0x1c   : > { %p2849_p4 = pneg %p2848_p3 }
  0x1d   : > { %p2855_p13 = por %p2854_p10, %p2853_p7 }
  0x1f   : > { %p2856_p12 = pnand %p2855_p13, %p2849_p4 }
  0x21   : > { %2859 = shalt.err (!%p2856_p12)
}
  0x22   : > { %s2860_s28 = scalar_lea.vmem %s3065_s9, 12544  ;;  %s2959_s29 = smov [#allocation2]  }
  0x23   : > { %p2861_p1 = scmp.ne.s32.totalorder %s3065_s9, %s2860_s28  ;;  %s2865_s30 = sshll.u32 %s2959_s29, 4  ;;  %s2866_s30 = int_to_ptr.vmem [resolvable:$false] %s2865_s30 }
  0x24   : > { %s2867_s5 = scalar_lea.vmem %s2866_s30, 25088  ;;  %p2868_p9 = scmp.lt.s32.totalorder %s3065_s9, %s2866_s30 }
  0x25   : > { %p2863_p3 = pnand %p2861_p1, %p2847_p2  ;;  %p2869_p5 = scmp.lt.s32.totalorder %s2867_s5, %s2860_s28 }
  0x27   : > { %p2864_p11 = pneg %p2863_p3  ;;  %p2870_p6 = por %p2869_p5, %p2868_p9 }
  0x29   : > { %p2871_p7 = pnand %p2870_p6, %p2864_p11 }
  0x2b   : > { %2874 = shalt.err (!%p2871_p7)
}
  0x2c   : > { %s2960_s6 = smov 12544   ;;  %s2961_s8 = smov 6272  }
  0x2d   : > { %s2962_s11 = smov 392   ;;  %p2560_p12 = scmp.ge.s32.totalorder %s2957_s17, 1 }
  0x2e   : > { %2782 = dma.hbm_to_vmem [thread:$0]  (!%p3056_p0), %s3063_s7, 12544, %s3065_s9, %s3067_s10, %s2960_s6, %s2961_s8, %s2962_s11  }
  0x2f   : > { %p174_p2 = scmp.lt.s32.totalorder %s2957_s17, 3 }
  0x31   : > { %p175_p4 = pnand %p2560_p12, %p174_p2 }
  0x33   : > { %178 = sbr.rel (%p175_p4) target bundleno = 540 (0x21c), region = 28 }
  0x3a   : > { %s3098_s18 = sand.u32 1, %s2941_s13  }
  0x3b   : > { %s2774_s19 = smul.u32 784, %s3098_s18  ;;  %s181_s21 = scalar_lea.sflag [#allocation3], %s3098_s18 }
  0x3d   : > { %s3102_s22 = scalar_lea.vmem [#allocation2], %s2774_s19 }
  0x3e   : > { %2928 = dma.done.wait (%p3035_p8), %s181_s21, 12544  }
  0x3f   : > { %2930 = vsyncadd (%p3035_p8), %s181_s21, 4294954752  ;;  %v2963_v0 = vmov 0   ;;  %v327_v1 = vld [vmem:[%s3900_s0] sm:$0xff]  ;;  %v328_v2 = vld [vmem:[%s3900_s0 + $0x8] sm:$0xff]  ;;  %p214_p9 = scmp.lt.s32.totalorder %s2949_s15, 1  ;;  %vm223_vm0 = vcmask 7168  }
  0x40   : > { %2844 = vset.pattern.permute.xlu0 %v2963_v0  ;;  %v3905_v3 = vmov 0.0   ;;  %v230_v4 = vld [vmem:[%s3102_s22 + $0x8] sm:$0xff]  ;;  %v229_v6 = vld [vmem:[%s3102_s22] sm:$0xff]  ;;  %v231_v10 = vld [vmem:[%s3102_s22 + $0x10] sm:$0xff]  ;;  %s2561_s5 = sshll.u32 %s3098_s18, 4  ;;  %vm226_vm1 = vcmask 130048  }
  0x41   : > { %331 = vperm.xlu0 %2844, %v327_v1   ;;  %s215_s24 = scalar_select %p214_p9, %s2949_s15, 1  ;;  %v254_v5 = vld [vmem:[%s3102_s22 + $0xc8] sm:$0xff]  ;;  %v279_v12 = vld [vmem:[%s3102_s22 + $0x190] sm:$0xff]  ;;  %v280_v15 = vld [vmem:[%s3102_s22 + $0x198] sm:$0xff] }
  0x42   : > { %v303_v13 = vld [vmem:[%s3102_s22 + $0x250] sm:$0xff]  ;;  %v278_v14 = vld [vmem:[%s3102_s22 + $0x188] sm:$0xff]  ;;  %v232_v24 = vld [vmem:[%s3102_s22 + $0x18] sm:$0xff]  ;;  %s3824_s6 = scalar_lea.vmem [#allocation5], %s2561_s5  ;;  %s2571_s8 = sshll.u32 %s2949_s15, 8 }
  0x43   : > { %s2570_s23 = sshll.u32 %s215_s24, 4  ;;  %v233_v29 = vld [vmem:[%s3102_s22 + $0x20] sm:$0xff]  ;;  %v234_v30 = vld [vmem:[%s3102_s22 + $0x28] sm:$0xff]  ;;  %v256_v36 = vld [vmem:[%s3102_s22 + $0xd8] sm:$0xff]  ;;  %s2448_s11 = sshll.u32 %s3824_s6, 4  ;;  %s3847_s11 = int_to_ptr.vmem [resolvable:$true] %s2448_s11 }
  0x44   : > { %s3119_s30 = scalar_lea.vmem %s3902_s2, %s2570_s23  ;;  %v253_v31 = vld [vmem:[%s3102_s22 + $0xc0] sm:$0xff]  ;;  %v302_v32 = vld [vmem:[%s3102_s22 + $0x248] sm:$0xff]  ;;  %v283_v38 = vld [vmem:[%s3102_s22 + $0x1b0] sm:$0xff]  ;;  %s2432_s15 = scalar_lea.sflag [#allocation4], %s3098_s18 }
  0x45   : > { %336 = vperm.xlu0 %2844, %v328_v2   ;;  %224 = vst.msk [vmem:[%s3119_s30] sm:$0xff] %vm223_vm0, %v3905_v3  ;;  %225 = vst.msk [vmem:[%s3119_s30 + $0x8] sm:$0xff] %vm223_vm0, %v3905_v3  ;;  %v281_v33 = vld [vmem:[%s3102_s22 + $0x1a0] sm:$0xff]  ;;  %v235_v44 = vld [vmem:[%s3102_s22 + $0x30] sm:$0xff]  ;;  %s2875_s4 = scalar_lea.vmem %s3847_s11, 256  ;;  %p4004_p11 = scmp.ne.s32.totalorder %s3948_s25, 0 }
  0x46   : > { %v305_v37 = vld [vmem:[%s3102_s22 + $0x260] sm:$0xff]  ;;  %v282_v49 = vld [vmem:[%s3102_s22 + $0x1a8] sm:$0xff]  ;;  %v236_v50 = vld [vmem:[%s3102_s22 + $0x38] sm:$0xff]  ;;  %p2876_p8 = scmp.ne.s32.totalorder %s3847_s11, %s2875_s4  ;;  %s2965_s7 = smov [#allocation5]  }
  0x47   : > { %v237_v51 = vld [vmem:[%s3102_s22 + $0x40] sm:$0xff]  ;;  %v304_v57 = vld [vmem:[%s3102_s22 + $0x258] sm:$0xff]  ;;  %v238_v58 = vld [vmem:[%s3102_s22 + $0x48] sm:$0xff]  ;;  %s2879_s9 = sshll.u32 %s2965_s7, 4  ;;  %s2880_s9 = int_to_ptr.vmem [resolvable:$false] %s2879_s9 }
  0x48   : > { %v239_v59 = vld [vmem:[%s3102_s22 + $0x50] sm:$0xff]  ;;  %v240_v0 = vld [vmem:[%s3102_s22 + $0x58] sm:$0xff]  ;;  %p2877_p0 = pnand %p2876_p8, %p4004_p11  ;;  %s2881_s10 = scalar_lea.vmem %s2880_s9, 512 }
  0x49   : > { %v307_v62 = vld [vmem:[%s3102_s22 + $0x270] sm:$0xff]  ;;  %p2882_p13 = scmp.lt.s32.totalorder %s3847_s11, %s2880_s9  ;;  %p2883_p1 = scmp.lt.s32.totalorder %s2881_s10, %s2875_s4 }
  0x4a   : > { %v255_v1 = vld [vmem:[%s3102_s22 + $0xd0] sm:$0xff]  ;;  %p2878_p10 = pneg %p2877_p0 }
  0x4b   : > { %p2884_p3 = por %p2883_p1, %p2882_p13 }
  0x4d   : > { %p2885_p5 = pnand %p2884_p3, %p2878_p10 }
  0xc0   : > { %v3130_v7 = vpop.permute.xlu0 %331 }
  0xc1   : > { %v340_v8 = vsub.f32 %v230_v4, %v3130_v7  ;;  %v3134_v9 = vsub.f32 %v254_v5, %v3130_v7  ;;  %v3138_v11 = vsub.f32 %v229_v6, %v3130_v7  ;;  %v3149_v18 = vsub.f32 %v231_v10, %v3130_v7  ;;  %v284_v6 = vld [vmem:[%s3102_s22 + $0x1b8] sm:$0xff]  ;;  %v242_v10 = vld [vmem:[%s3102_s22 + $0x68] sm:$0xff] }
  0xc2   : > { %v3179_v35 = vsub.f32 %v232_v24, %v3130_v7  ;;  %v3185_v39 = vsub.f32 %v233_v29, %v3130_v7  ;;  %v3188_v40 = vsub.f32 %v253_v31, %v3130_v7  ;;  %v3199_v45 = vsub.f32 %v234_v30, %v3130_v7  ;;  %v245_v31 = vld [vmem:[%s3102_s22 + $0x80] sm:$0xff] }
  0xc3   : > { %610 = vmatprep.mubr.f32.mxu1 %v340_v8  ;;  %1510 = vmatprep.mubr.f32.mxu0 %v3134_v9  ;;  %v439_v16 = vadd.f32 %v340_v8, %v3138_v11  ;;  %v3202_v46 = vsub.f32 %v256_v36, %v3130_v7  ;;  %v3225_v60 = vsub.f32 %v235_v44, %v3130_v7 }
  0xc4   : > { %v3146_v17 = vpop.permute.xlu0 %336  ;;  %v3235_v2 = vsub.f32 %v236_v50, %v3130_v7  ;;  %v3238_v4 = vsub.f32 %v237_v51, %v3130_v7  ;;  %v3258_v24 = vsub.f32 %v239_v59, %v3130_v7  ;;  %v306_v50 = vld [vmem:[%s3102_s22 + $0x268] sm:$0xff] }
  0xc5   : > { %v3152_v19 = vsub.f32 %v279_v12, %v3146_v17  ;;  %v3155_v20 = vsub.f32 %v303_v13, %v3146_v17  ;;  %v3158_v21 = vsub.f32 %v278_v14, %v3146_v17  ;;  %v3161_v22 = vsub.f32 %v280_v15, %v3146_v17  ;;  %v258_v15 = vld [vmem:[%s3102_s22 + $0xe8] sm:$0xff] }
  0xc6   : > { %v440_v23 = vadd.f32 %v439_v16, %v3149_v18  ;;  %v3191_v41 = vsub.f32 %v302_v32, %v3146_v17  ;;  %v3195_v43 = vsub.f32 %v281_v33, %v3146_v17  ;;  %v3205_v47 = vsub.f32 %v305_v37, %v3146_v17  ;;  %v286_v37 = vld [vmem:[%s3102_s22 + $0x1c8] sm:$0xff] }
  0xc7   : > { %v2583_v25 = vpack.c.bf16 %v3152_v19, %v340_v8  ;;  %v2631_v26 = vpack.c.bf16 %v3155_v20, %v3134_v9  ;;  %v489_v27 = vadd.f32 %v3152_v19, %v3158_v21  ;;  %v2585_v28 = vpack.c.bf16 %v3158_v21, %v3138_v11  ;;  %v241_v8 = vld [vmem:[%s3102_s22 + $0x60] sm:$0xff] }
  0xc8   : > { %v441_v42 = vadd.f32 %v440_v23, %v3179_v35  ;;  %3951 = vst [vmem:[#allocation8_spill] sm:$0xff] %v3205_v47  ;;  %v3208_v48 = vsub.f32 %v283_v38, %v3146_v17  ;;  %v2633_v53 = vpack.c.bf16 %v3191_v41, %v3188_v40  ;;  %v2587_v55 = vpack.c.bf16 %v3195_v43, %v3179_v35  ;;  %v246_v38 = vld [vmem:[%s3102_s22 + $0x88] sm:$0xff] }
  0xc9   : > { %2584 = vmatprep.subr.bf16.mxu1 %v2583_v25  ;;  %2632 = vmatprep.subr.bf16.mxu0 %v2631_v26  ;;  %v490_v34 = vadd.f32 %v489_v27, %v3161_v22  ;;  %v2635_v56 = vpack.c.bf16 %v3205_v47, %v3202_v46  ;;  %v3230_v63 = vsub.f32 %v282_v49, %v3146_v17  ;;  %v285_v25 = vld [vmem:[%s3102_s22 + $0x1c0] sm:$0xff]  ;;  %v243_v26 = vld [vmem:[%s3102_s22 + $0x70] sm:$0xff]  ;;  %v244_v27 = vld [vmem:[%s3102_s22 + $0x78] sm:$0xff] }
  0xca   : > { %2586 = vmatpush1.bf16.xpose.msra.mxu1 %v2585_v28  ;;  %v442_v52 = vadd.f32 %v441_v42, %v3185_v39  ;;  %2634 = vmatpush1.bf16.xpose.msra.mxu0 %v2633_v53  ;;  %v2589_v5 = vpack.c.bf16 %v3161_v22, %v3149_v18  ;;  %v3248_v13 = vsub.f32 %v304_v57, %v3146_v17  ;;  %v247_v42 = vld [vmem:[%s3102_s22 + $0x90] sm:$0xff]  ;;  %v257_v57 = vld [vmem:[%s3102_s22 + $0xe0] sm:$0xff] }
  0xcb   : > { %v491_v54 = vadd.f32 %v490_v34, %v3195_v43  ;;  %2588 = vmatprep.subr.bf16.mxu1 %v2587_v55  ;;  %2636 = vmatprep.subr.bf16.mxu0 %v2635_v56  ;;  %v2591_v14 = vpack.c.bf16 %v3208_v48, %v3199_v45  ;;  %v3255_v23 = vsub.f32 %v238_v58, %v3130_v7  ;;  %v309_v58 = vld [vmem:[%s3102_s22 + $0x280] sm:$0xff] }
  0xcc   : > { %v443_v61 = vadd.f32 %v442_v52, %v3199_v45  ;;  %3952 = vst [vmem:[#allocation9_spill] sm:$0xff] %v3248_v13  ;;  %v3268_v28 = vsub.f32 %v255_v1, %v3130_v7  ;;  %v3277_v32 = vsub.f32 %v240_v0, %v3130_v7  ;;  %v3280_v33 = vsub.f32 %v241_v8, %v3130_v7  ;;  %v249_v8 = vld [vmem:[%s3102_s22 + $0xa0] sm:$0xff] }
  0xcd   : > { %v492_v16 = vadd.f32 %v491_v54, %v3230_v63  ;;  %v3283_v34 = vsub.f32 %v242_v10, %v3130_v7  ;;  %v3286_v36 = vsub.f32 %v258_v15, %v3130_v7  ;;  %v3297_v51 = vsub.f32 %v285_v25, %v3146_v17  ;;  %v250_v10 = vld [vmem:[%s3102_s22 + $0xa8] sm:$0xff]  ;;  %v260_v15 = vld [vmem:[%s3102_s22 + $0xf8] sm:$0xff] }
  0xce   : > { %v444_v12 = vadd.f32 %v443_v61, %v3225_v60  ;;  %v2637_v49 = vpack.c.bf16 %v3248_v13, %v3268_v28  ;;  %v3301_v53 = vsub.f32 %v243_v26, %v3130_v7  ;;  %v3304_v54 = vsub.f32 %v244_v27, %v3130_v7 }
  0xcf   : > { %v493_v30 = vadd.f32 %v492_v16, %v3208_v48  ;;  %3954 = vst [vmem:[#allocation11_spill] sm:$0xff] %v3286_v36  ;;  %v3317_v61 = vsub.f32 %v286_v37, %v3146_v17  ;;  %v3321_v0 = vsub.f32 %v245_v31, %v3130_v7  ;;  %v3327_v1 = vsub.f32 %v247_v42, %v3130_v7  ;;  %v252_v31 = vld [vmem:[%s3102_s22 + $0xb8] sm:$0xff] }
  0xd0   : > { %v445_v29 = vadd.f32 %v444_v12, %v3235_v2  ;;  %3955 = vst [vmem:[#allocation12_spill] sm:$0xff] %v3301_v53  ;;  %v3347_v26 = vsub.f32 %v257_v57, %v3130_v7  ;;  %v3352_v27 = vsub.f32 %v309_v58, %v3146_v17  ;;  %v308_v57 = vld [vmem:[%s3102_s22 + $0x278] sm:$0xff]  ;;  %v262_v58 = vld [vmem:[%s3102_s22 + $0x108] sm:$0xff] }
  0xd1   : > { %611 = vmatmul.mubr.f32.vlgmr.msra.gmra.mrb[0].mxu1 %v3138_v11  ;;  %v3262_v11 = vsub.f32 %v307_v62, %v3146_v17  ;;  %1511 = vmatmul.mubr.f32.vlgmr.msra.gmra.mrb[0].mxu0 %v3188_v40  ;;  %v248_v62 = vld [vmem:[%s3102_s22 + $0x98] sm:$0xff]  ;;  %3956 = vst [vmem:[#allocation13_spill] sm:$0xff] %v3321_v0  ;;  %3958 = vst [vmem:[#allocation15_spill] sm:$0xff] %v3327_v1 }
  0xd2   : > { %615 = vmatprep.mubr.f32.mxu1 %v3152_v19  ;;  %2590 = vmatpush1.bf16.xpose.msra.mxu1 %v2589_v5  ;;  %v3273_v19 = vsub.f32 %v284_v6, %v3146_v17  ;;  %v446_v44 = vadd.f32 %v445_v29, %v3238_v4  ;;  %v3330_v5 = vsub.f32 %v306_v50, %v3146_v17  ;;  %v288_v6 = vld [vmem:[%s3102_s22 + $0x1d8] sm:$0xff]  ;;  %v289_v29 = vld [vmem:[%s3102_s22 + $0x1e0] sm:$0xff] }
  0xd3   : > { %3953 = vst [vmem:[#allocation10_spill] sm:$0xff] %v3262_v11  ;;  %2592 = vmatprep.subr.bf16.mxu1 %v2591_v14  ;;  %v2639_v55 = vpack.c.bf16 %v3262_v11, %v3286_v36  ;;  %1515 = vmatprep.mubr.f32.mxu0 %v3155_v20  ;;  %v2593_v14 = vpack.c.bf16 %v3230_v63, %v3185_v39 }
  0xd4   : > { %v494_v52 = vadd.f32 %v493_v30, %v3273_v19  ;;  %v447_v56 = vadd.f32 %v446_v44, %v3255_v23  ;;  %2638 = vmatpush1.bf16.xpose.msra.mxu0 %v2637_v49  ;;  %v251_v30 = vld [vmem:[%s3102_s22 + $0xb0] sm:$0xff]  ;;  %v3364_v42 = vsub.f32 %v248_v62, %v3130_v7  ;;  %v3367_v44 = vsub.f32 %v249_v8, %v3130_v7 }
  0xd5   : > { %616 = vmatmul.mubr.f32.gmra.mrb[2].mxu1 %v3158_v21  ;;  %v287_v21 = vld [vmem:[%s3102_s22 + $0x1d0] sm:$0xff]  ;;  %2640 = vmatprep.subr.bf16.mxu0 %v2639_v55  ;;  %v3370_v49 = vsub.f32 %v250_v10, %v3130_v7  ;;  %v3373_v50 = vsub.f32 %v260_v15, %v3130_v7  ;;  %v290_v55 = vld [vmem:[%s3102_s22 + $0x1e8] sm:$0xff]  ;;  %v3385_v62 = vsub.f32 %v289_v29, %v3146_v17 }
  0xd6   : > { %685 = vmatprep.mubr.f32.mxu1 %v3179_v35  ;;  %v495_v59 = vadd.f32 %v494_v52, %v3297_v51  ;;  %v3324_v35 = vsub.f32 %v246_v38, %v3130_v7  ;;  %v448_v12 = vadd.f32 %v447_v56, %v3258_v24  ;;  %v3341_v16 = vsub.f32 %v287_v21, %v3146_v17  ;;  %v259_v52 = vld [vmem:[%s3102_s22 + $0xf0] sm:$0xff]  ;;  %v310_v15 = vld [vmem:[%s3102_s22 + $0x288] sm:$0xff] }
  0xd7   : > { %1516 = vmatmul.mubr.f32.gmra.mrb[2].mxu0 %v3191_v41  ;;  %v3361_v38 = vsub.f32 %v288_v6, %v3146_v17  ;;  %3959 = vst [vmem:[#allocation16_spill] sm:$0xff] %v3367_v44  ;;  %3960 = vst [vmem:[#allocation17_spill] sm:$0xff] %v3370_v49  ;;  %v2641_v56 = vpack.c.bf16 %v3330_v5, %v3347_v26  ;;  %v3389_v8 = vsub.f32 %v251_v30, %v3130_v7 }
  0xd8   : > { %3957 = vst [vmem:[#allocation14_spill] sm:$0xff] %v3324_v35  ;;  %v496_v25 = vadd.f32 %v495_v59, %v3317_v61  ;;  %v449_v37 = vadd.f32 %v448_v12, %v3277_v32  ;;  %1585 = vmatprep.mubr.f32.mxu0 %v3202_v46  ;;  %v311_v59 = vld [vmem:[%s3102_s22 + $0x290] sm:$0xff]  ;;  %3961 = vst [vmem:[#allocation18_spill] sm:$0xff] %v3385_v62  ;;  %v3392_v10 = vsub.f32 %v252_v31, %v3130_v7 }
  0xd9   : > { %686 = vmatmul.mubr.f32.vlgmr.msra.gmra.mrb[0].mxu1 %v3149_v18  ;;  %v2595_v18 = vpack.c.bf16 %v3297_v51, %v3235_v2  ;;  %3962 = vst [vmem:[#allocation19_spill] sm:$0xff] %v3389_v8  ;;  %v291_v12 = vld [vmem:[%s3102_s22 + $0x1f0] sm:$0xff]  ;;  %v3405_v29 = vsub.f32 %v290_v55, %v3146_v17  ;;  %v3408_v30 = vsub.f32 %v259_v52, %v3130_v7 }
  0xda   : > { %690 = vmatprep.mubr.f32.mxu1 %v3195_v43  ;;  %2594 = vmatpush1.bf16.xpose.msra.mxu1 %v2593_v14  ;;  %v497_v43 = vadd.f32 %v496_v25, %v3341_v16  ;;  %v450_v21 = vadd.f32 %v449_v37, %v3280_v33  ;;  %v313_v25 = vld [vmem:[%s3102_s22 + $0x2a0] sm:$0xff]  ;;  %v3414_v31 = vsub.f32 %v262_v58, %v3130_v7 }
  0xdb   : > { %2596 = vmatprep.subr.bf16.mxu1 %v2595_v18  ;;  %1586 = vmatmul.mubr.f32.vlgmr.msra.gmra.mrb[0].mxu0 %v3268_v28  ;;  %v3417_v37 = vsub.f32 %v311_v59, %v3146_v17  ;;  %v2597_v55 = vpack.c.bf16 %v3273_v19, %v3225_v60  ;;  %v3426_v52 = vsub.f32 %v291_v12, %v3146_v17 }
  0xdc   : > { %v498_v6 = vadd.f32 %v497_v43, %v3361_v38  ;;  %v451_v14 = vadd.f32 %v450_v21, %v3283_v34  ;;  %1590 = vmatprep.mubr.f32.mxu0 %v3205_v47  ;;  %2642 = vmatpush1.bf16.xpose.msra.mxu0 %v2641_v56  ;;  %v292_v43 = vld [vmem:[%s3102_s22 + $0x1f8] sm:$0xff]  ;;  %v261_v56 = vld [vmem:[%s3102_s22 + $0x100] sm:$0xff]  ;;  %v2599_v58 = vpack.c.bf16 %v3341_v16, %v3255_v23  ;;  %v318_v47 = vld [vmem:[%s3102_s22 + $0x2c8] sm:$0xff] }
  0xdd   : > { %691 = vmatmul.mubr.f32.gmra.mrb[2].mxu1 %v3161_v22  ;;  %v2643_v22 = vpack.c.bf16 %v3352_v27, %v3373_v50  ;;  %v3434_v59 = vsub.f32 %v310_v15, %v3146_v17 }
  0xde   : > { %760 = vmatprep.mubr.f32.mxu1 %v3199_v45  ;;  %v499_v18 = vadd.f32 %v498_v6, %v3385_v62  ;;  %v3411_v45 = vsub.f32 %v308_v57, %v3146_v17  ;;  %v452_v21 = vadd.f32 %v451_v14, %v3301_v53  ;;  %v264_v6 = vld [vmem:[%s3102_s22 + $0x118] sm:$0xff]  ;;  %v293_v14 = vld [vmem:[%s3102_s22 + $0x200] sm:$0xff] }
  0xdf   : > { %2644 = vmatprep.subr.bf16.mxu0 %v2643_v22  ;;  %1591 = vmatmul.mubr.f32.gmra.mrb[2].mxu0 %v3248_v13  ;;  %v3437_v22 = vsub.f32 %v313_v25, %v3146_v17  ;;  %v2647_v25 = vpack.c.bf16 %v3417_v37, %v3414_v31  ;;  %v3455_v3 = vsub.f32 %v264_v6, %v3130_v7  ;;  %v272_v13 = vld [vmem:[%s3102_s22 + $0x158] sm:$0xff] }
  0xe0   : > { %v500_v57 = vadd.f32 %v499_v18, %v3405_v29  ;;  %v453_v12 = vadd.f32 %v452_v21, %v3304_v54  ;;  %1660 = vmatprep.mubr.f32.mxu0 %v3286_v36  ;;  %v3445_v18 = vsub.f32 %v292_v43, %v3146_v17  ;;  %v2645_v15 = vpack.c.bf16 %v3411_v45, %v3408_v30 }
  0xe1   : > { %761 = vmatmul.mubr.f32.vlgmr.msra.gmra.mrb[0].mxu1 %v3185_v39  ;;  %v3452_v21 = vsub.f32 %v261_v56, %v3130_v7  ;;  %v2601_v43 = vpack.c.bf16 %v3317_v61, %v3238_v4  ;;  %v269_v56 = vld [vmem:[%s3102_s22 + $0x140] sm:$0xff] }
  0xe2   : > { %765 = vmatprep.mubr.f32.mxu1 %v3208_v48  ;;  %v501_v39 = vadd.f32 %v500_v57, %v3426_v52  ;;  %3963 = vst [vmem:[#allocation20_spill] sm:$0xff] %v3445_v18  ;;  %2598 = vmatpush1.bf16.xpose.msra.mxu1 %v2597_v55  ;;  %v294_v48 = vld [vmem:[%s3102_s22 + $0x208] sm:$0xff]  ;;  %v454_v57 = vadd.f32 %v453_v12, %v3321_v0  ;;  %v263_v12 = vld [vmem:[%s3102_s22 + $0x110] sm:$0xff] }
  0xe3   : > { %2600 = vmatprep.subr.bf16.mxu1 %v2599_v58  ;;  %v3462_v55 = vsub.f32 %v293_v14, %v3146_v17  ;;  %1661 = vmatmul.mubr.f32.vlgmr.msra.gmra.mrb[0].mxu0 %v3347_v26  ;;  %v2649_v6 = vpack.c.bf16 %v3434_v59, %v3452_v21  ;;  %v2603_v58 = vpack.c.bf16 %v3385_v62, %v3277_v32  ;;  %v321_v62 = vld [vmem:[%s3102_s22 + $0x2e0] sm:$0xff] }
  0xe4   : > { %v502_v53 = vadd.f32 %v501_v39, %v3445_v18  ;;  %v295_v39 = vld [vmem:[%s3102_s22 + $0x210] sm:$0xff]  ;;  %v455_v0 = vadd.f32 %v454_v57, %v3324_v35  ;;  %1665 = vmatprep.mubr.f32.mxu0 %v3262_v11  ;;  %2646 = vmatpush1.bf16.xpose.msra.mxu0 %v2645_v15  ;;  %v312_v18 = vld [vmem:[%s3102_s22 + $0x298] sm:$0xff]  ;;  %v3482_v36 = vsub.f32 %v294_v48, %v3146_v17  ;;  %v266_v11 = vld [vmem:[%s3102_s22 + $0x128] sm:$0xff] }
  0xe5   : > { %766 = vmatmul.mubr.f32.gmra.mrb[2].mxu1 %v3230_v63  ;;  %2648 = vmatprep.subr.bf16.mxu0 %v2647_v25  ;;  %v3490_v15 = vsub.f32 %v269_v56, %v3130_v7  ;;  %v3493_v14 = vsub.f32 %v318_v47, %v3146_v17  ;;  %v3498_v35 = vsub.f32 %v263_v12, %v3130_v7  ;;  %v271_v57 = vld [vmem:[%s3102_s22 + $0x150] sm:$0xff]  ;;  %v320_v56 = vld [vmem:[%s3102_s22 + $0x2d8] sm:$0xff]  ;;  %v297_v12 = vld [vmem:[%s3102_s22 + $0x220] sm:$0xff] }
  0xe6   : > { %v503_v63 = vadd.f32 %v502_v53, %v3462_v55  ;;  %3964 = vst [vmem:[#allocation21_spill] sm:$0xff] %v3482_v36  ;;  %835 = vmatprep.mubr.f32.mxu1 %v3235_v2  ;;  %v296_v53 = vld [vmem:[%s3102_s22 + $0x218] sm:$0xff]  ;;  %v456_v48 = vadd.f32 %v455_v0, %v3327_v1  ;;  %v3501_v25 = vsub.f32 %v295_v39, %v3146_v17 }
  0xe7   : > { %3965 = vst [vmem:[#allocation22_spill] sm:$0xff] %v3490_v15  ;;  %3966 = vst [vmem:[#allocation23_spill] sm:$0xff] %v3493_v14  ;;  %1666 = vmatmul.mubr.f32.gmra.mrb[2].mxu0 %v3330_v5  ;;  %v3508_v47 = vsub.f32 %v312_v18, %v3146_v17  ;;  %v3515_v39 = vsub.f32 %v272_v13, %v3130_v7  ;;  %v315_v18 = vld [vmem:[%s3102_s22 + $0x2b0] sm:$0xff]  ;;  %v3526_v0 = vsub.f32 %v296_v53, %v3146_v17  ;;  %v274_v15 = vld [vmem:[%s3102_s22 + $0x168] sm:$0xff] }
  0xe8   : > { %v504_v2 = vadd.f32 %v503_v63, %v3482_v36  ;;  %v3518_v63 = vsub.f32 %v321_v62, %v3146_v17  ;;  %v457_v1 = vadd.f32 %v456_v48, %v3364_v42  ;;  %1735 = vmatprep.mubr.f32.mxu0 %v3373_v50  ;;  %v323_v13 = vld [vmem:[%s3102_s22 + $0x2f0] sm:$0xff]  ;;  %v3534_v48 = vsub.f32 %v271_v57, %v3130_v7  ;;  %v273_v62 = vld [vmem:[%s3102_s22 + $0x160] sm:$0xff]  ;;  %v322_v57 = vld [vmem:[%s3102_s22 + $0x2e8] sm:$0xff] }
  0xe9   : > { %836 = vmatmul.mubr.f32.vlgmr.msra.gmra.mrb[0].mxu1 %v3225_v60  ;;  %3967 = vst [vmem:[#allocation24_spill] sm:$0xff] %v3526_v0  ;;  %v3537_v60 = vsub.f32 %v320_v56, %v3146_v17  ;;  %v3542_v53 = vsub.f32 %v266_v11, %v3130_v7  ;;  %v3552_v56 = vsub.f32 %v315_v18, %v3146_v17  ;;  %v299_v11 = vld [vmem:[%s3102_s22 + $0x230] sm:$0xff] }
  0xea   : > { %v505_v36 = vadd.f32 %v504_v2, %v3501_v25  ;;  %840 = vmatprep.mubr.f32.mxu1 %v3297_v51  ;;  %2602 = vmatpush1.bf16.xpose.msra.mxu1 %v2601_v43  ;;  %3968 = vst [vmem:[#allocation25_spill] sm:$0xff] %v3534_v48  ;;  %v298_v2 = vld [vmem:[%s3102_s22 + $0x228] sm:$0xff]  ;;  %v458_v14 = vadd.f32 %v457_v1, %v3367_v44  ;;  %v276_v1 = vld [vmem:[%s3102_s22 + $0x178] sm:$0xff]  ;;  %v325_v48 = vld [vmem:[%s3102_s22 + $0x300] sm:$0xff] }
  0xeb   : > { %3969 = vst [vmem:[#allocation26_spill] sm:$0xff] %v3537_v60  ;;  %2604 = vmatprep.subr.bf16.mxu1 %v2603_v58  ;;  %v3545_v51 = vsub.f32 %v297_v12, %v3146_v17  ;;  %1736 = vmatmul.mubr.f32.vlgmr.msra.gmra.mrb[0].mxu0 %v3408_v30  ;;  %v3558_v58 = vsub.f32 %v274_v15, %v3130_v7 }
  0xec   : > { %v506_v43 = vadd.f32 %v505_v36, %v3526_v0  ;;  %v3561_v12 = vsub.f32 %v323_v13, %v3146_v17  ;;  %v459_v36 = vadd.f32 %v458_v14, %v3370_v49  ;;  %1740 = vmatprep.mubr.f32.mxu0 %v3352_v27  ;;  %2650 = vmatpush1.bf16.xpose.msra.mxu0 %v2649_v6 }
  0xed   : > { %3970 = vst [vmem:[#allocation27_spill] sm:$0xff] %v3558_v58  ;;  %v3567_v44 = vsub.f32 %v298_v2, %v3146_v17  ;;  %v3973_v15 = vpack.c.bf16 %v3437_v22, %v3455_v3  ;;  %841 = vmatmul.mubr.f32.gmra.mrb[2].mxu1 %v3273_v19  ;;  %v3578_v6 = vsub.f32 %v273_v62, %v3130_v7  ;;  %v300_v2 = vld [vmem:[%s3102_s22 + $0x238] sm:$0xff]  ;;  %v277_v62 = vld [vmem:[%s3102_s22 + $0x180] sm:$0xff] }
  0xee   : > { %3971 = vst [vmem:[#allocation28_spill] sm:$0xff] %v3561_v12  ;;  %v507_v18 = vadd.f32 %v506_v43, %v3545_v51  ;;  %v3581_v13 = vsub.f32 %v322_v57, %v3146_v17  ;;  %v275_v43 = vld [vmem:[%s3102_s22 + $0x170] sm:$0xff]  ;;  %v460_v60 = vadd.f32 %v459_v36, %v3389_v8  ;;  %910 = vmatprep.mubr.f32.mxu1 %v3255_v23  ;;  %v324_v58 = vld [vmem:[%s3102_s22 + $0x2f8] sm:$0xff]  ;;  %v326_v12 = vld [vmem:[%s3102_s22 + $0x308] sm:$0xff] }
  0xef   : > { %3972 = vst [vmem:[#allocation29_spill] sm:$0xff] %v3567_v44  ;;  %2652 = vmatprep.subr.bf16.mxu0 %v3973_v15  ;;  %v2653_v15 = vpack.c.bf16 %v3508_v47, %v3498_v35  ;;  %v3590_v19 = vsub.f32 %v299_v11, %v3146_v17  ;;  %1741 = vmatmul.mubr.f32.gmra.mrb[2].mxu0 %v3411_v45  ;;  %v301_v23 = vld [vmem:[%s3102_s22 + $0x240] sm:$0xff] }
  0xf0   : > { %v508_v14 = vadd.f32 %v507_v18, %v3567_v44  ;;  %v2607_v57 = vpack.c.bf16 %v3426_v52, %v3283_v34  ;;  %v2673_v36 = vpack.c.bf16 %v3581_v13, %v3578_v6  ;;  %v3603_v8 = vsub.f32 %v276_v1, %v3130_v7  ;;  %1810 = vmatprep.mubr.f32.mxu0 %v3414_v31  ;;  %v268_v1 = vld [vmem:[%s3102_s22 + $0x138] sm:$0xff] }
  0xf1   : > { %v3606_v11 = vsub.f32 %v325_v48, %v3146_v17  ;;  %v461_v18 = vadd.f32 %v460_v60, %v3392_v10  ;;  %v3611_v44 = vsub.f32 %v300_v2, %v3146_v17  ;;  %v3615_v0 = vsub.f32 %v275_v43, %v3130_v7  ;;  %911 = vmatmul.mubr.f32.vlgmr.msra.gmra.mrb[0].mxu1 %v3238_v4 }
  0xf2   : > { %v509_v49 = vadd.f32 %v508_v14, %v3590_v19  ;;  %v3621_v48 = vsub.f32 %v324_v58, %v3146_v17  ;;  %v3624_v60 = vsub.f32 %v277_v62, %v3130_v7  ;;  %v3627_v2 = vsub.f32 %v326_v12, %v3146_v17  ;;  %915 = vmatprep.mubr.f32.mxu1 %v3341_v16 }
  0xf3   : > { %v462_v14 = vadd.f32 %v461_v18, %v3188_v40  ;;  %v3974_v4 = vpack.c.bf16 %v3361_v38, %v3258_v24  ;;  %v3635_v43 = vsub.f32 %v301_v23, %v3146_v17  ;;  %1811 = vmatmul.mubr.f32.vlgmr.msra.gmra.mrb[0].mxu0 %v3452_v21  ;;  %v2655_v12 = vpack.c.bf16 %v3552_v56, %v3542_v53  ;;  %v314_v40 = vld [vmem:[%s3102_s22 + $0x2a8] sm:$0xff]  ;;  %v265_v18 = vld [vmem:[%s3102_s22 + $0x120] sm:$0xff] }
  0xf4   : > { %v510_v58 = vadd.f32 %v509_v49, %v3611_v44  ;;  %v3646_v62 = vpack.c.bf16 %v3627_v2, %v3624_v60  ;;  %1815 = vmatprep.mubr.f32.mxu0 %v3417_v37  ;;  %2654 = vmatpush1.bf16.xpose.msra.mxu0 %v2653_v15  ;;  %v317_v49 = vld [vmem:[%s3102_s22 + $0x2c0] sm:$0xff]  ;;  %v3657_v16 = vsub.f32 %v314_v40, %v3146_v17 }
  0xf5   : > { %2606 = vmatpush1.bf16.xpose.msra.mxu1 %v3974_v4  ;;  %v463_v23 = vadd.f32 %v462_v14, %v3134_v9  ;;  %2656 = vmatprep.subr.bf16.mxu0 %v2655_v12  ;;  %v3663_v15 = vsub.f32 %v317_v49, %v3146_v17  ;;  %v3975_v12 = vld [vmem:[#allocation18_spill] sm:$0xff] }
  0xf6   : > { %2608 = vmatprep.subr.bf16.mxu1 %v2607_v57  ;;  %v511_v57 = vadd.f32 %v510_v58, %v3635_v43  ;;  %916 = vmatmul.mubr.f32.gmra.mrb[2].mxu1 %v3317_v61  ;;  %v3675_v58 = vsub.f32 %v268_v1, %v3130_v7  ;;  %v3977_v1 = vld [vmem:[#allocation11_spill] sm:$0xff] }
  0xf7   : > { %v464_v4 = vadd.f32 %v463_v23, %v3268_v28  ;;  %985 = vmatprep.mubr.f32.mxu1 %v3277_v32  ;;  %1816 = vmatmul.mubr.f32.gmra.mrb[2].mxu0 %v3434_v59  ;;  %v2609_v28 = vpack.c.bf16 %v3405_v29, %v3280_v33  ;;  %v375_v32 = vsub.f32 %v265_v18, %v3130_v7  ;;  %v3976_v23 = vld [vmem:[#allocation9_spill] sm:$0xff]  ;;  %v3978_v18 = vld [vmem:[#allocation8_spill] sm:$0xff] }
  0xf8   : > { %v512_v9 = vadd.f32 %v511_v57, %v3191_v41  ;;  %1885 = vmatprep.mubr.f32.mxu0 %v3455_v3  ;;  %v2611_v41 = vpack.c.bf16 %v3462_v55, %v3304_v54 }
  0xf9   : > { %v465_v14 = vadd.f32 %v464_v4, %v3202_v46  ;;  %v2657_v40 = vpack.c.bf16 %v3657_v16, %v375_v32 }
  0xfa   : > { %v513_v61 = vadd.f32 %v512_v9, %v3155_v20  ;;  %v2659_v20 = vpack.c.bf16 %v3663_v15, %v3675_v58  ;;  %v267_v9 = vld [vmem:[%s3102_s22 + $0x130] sm:$0xff] }
  0xfb   : > { %v466_v46 = vadd.f32 %v465_v14, %v3347_v26  ;;  %1886 = vmatmul.mubr.f32.vlgmr.msra.gmra.mrb[0].mxu0 %v3498_v35  ;;  %v319_v26 = vld [vmem:[%s3102_s22 + $0x2d0] sm:$0xff] }
  0xfc   : > { %986 = vmatmul.mubr.f32.vlgmr.msra.gmra.mrb[0].mxu1 %v3258_v24  ;;  %v514_v49 = vadd.f32 %v513_v61, %v3976_v23  ;;  %v316_v24 = vld [vmem:[%s3102_s22 + $0x2b8] sm:$0xff]  ;;  %1890 = vmatprep.mubr.f32.mxu0 %v3437_v22  ;;  %v270_v61 = vld [vmem:[%s3102_s22 + $0x148] sm:$0xff]  ;;  %s3845_s22 = scalar_lea.hbm %s3903_s3, %s2571_s8 }
  0xfd   : > { %990 = vmatprep.mubr.f32.mxu1 %v3975_v12  ;;  %2610 = vmatpush1.bf16.xpose.msra.mxu1 %v2609_v28  ;;  %v467_v57 = vadd.f32 %v466_v46, %v3977_v1  ;;  %v426_v28 = vsub.f32 %v316_v24, %v3146_v17  ;;  %v3698_v46 = vsub.f32 %v319_v26, %v3146_v17 }
  0xfe   : > { %2612 = vmatprep.subr.bf16.mxu1 %v2611_v41  ;;  %2658 = vmatpush1.bf16.xpose.msra.mxu0 %v2657_v40  ;;  %v515_v4 = vadd.f32 %v514_v49, %v3978_v18  ;;  %v3980_v40 = vld [vmem:[#allocation20_spill] sm:$0xff]  ;;  %v380_v24 = vsub.f32 %v270_v61, %v3130_v7 }
  0xff   : > { %2660 = vmatprep.subr.bf16.mxu0 %v2659_v20  ;;  %v468_v14 = vadd.f32 %v467_v57, %v3408_v30  ;;  %1891 = vmatmul.mubr.f32.gmra.mrb[2].mxu0 %v3508_v47  ;;  %v377_v30 = vsub.f32 %v267_v9, %v3130_v7  ;;  %v3982_v20 = vld [vmem:[#allocation14_spill] sm:$0xff] }
 0x100   : > { %991 = vmatmul.mubr.f32.gmra.mrb[2].mxu1 %v3361_v38  ;;  %v516_v41 = vadd.f32 %v515_v4, %v3330_v5  ;;  %1960 = vmatprep.mubr.f32.mxu0 %v3542_v53  ;;  %v3979_v38 = vld [vmem:[#allocation12_spill] sm:$0xff]  ;;  %v2615_v5 = vpack.c.bf16 %v3501_v25, %v3982_v20  ;;  %v2663_v57 = vpack.c.bf16 %v3698_v46, %v380_v24  ;;  %v3986_v4 = vld [vmem:[#allocation22_spill] sm:$0xff] }
 0x101   : > { %1060 = vmatprep.mubr.f32.mxu1 %v3283_v34  ;;  %v469_v12 = vadd.f32 %v468_v14, %v3373_v50  ;;  %v2613_v23 = vpack.c.bf16 %v3980_v40, %v3979_v38  ;;  %v3981_v34 = vld [vmem:[#allocation10_spill] sm:$0xff]  ;;  %v2661_v50 = vpack.c.bf16 %v426_v28, %v377_v30  ;;  %v3990_v14 = vld [vmem:[#allocation24_spill] sm:$0xff] }
 0x102   : > { %v517_v49 = vadd.f32 %v516_v41, %v3981_v34 }
 0x103   : > { %v470_v17 = vadd.f32 %v469_v12, %v3452_v21  ;;  %v3984_v21 = vld [vmem:[#allocation21_spill] sm:$0xff] }
 0x104   : > { %1061 = vmatmul.mubr.f32.vlgmr.msra.gmra.mrb[0].mxu1 %v3280_v33  ;;  %v518_v1 = vadd.f32 %v517_v49, %v3411_v45  ;;  %v3991_v12 = vld [vmem:[#allocation17_spill] sm:$0xff]  ;;  %v3995_v49 = vld [vmem:[#allocation28_spill] sm:$0xff] }
 0x105   : > { %1065 = vmatprep.mubr.f32.mxu1 %v3426_v52  ;;  %2614 = vmatpush1.bf16.xpose.msra.mxu1 %v2613_v23  ;;  %v471_v26 = vadd.f32 %v470_v17, %v3414_v31  ;;  %v3983_v31 = vld [vmem:[#allocation13_spill] sm:$0xff]  ;;  %v3992_v23 = vld [vmem:[#allocation26_spill] sm:$0xff]  ;;  %v3998_v17 = vld [vmem:[#allocation16_spill] sm:$0xff] }
 0x106   : > { %1961 = vmatmul.mubr.f32.vlgmr.msra.gmra.mrb[0].mxu0 %v375_v32  ;;  %2616 = vmatprep.subr.bf16.mxu1 %v2615_v5  ;;  %v519_v33 = vadd.f32 %v518_v1, %v3352_v27  ;;  %v2617_v18 = vpack.c.bf16 %v3984_v21, %v3983_v31 }
 0x107   : > { %1965 = vmatprep.mubr.f32.mxu0 %v3552_v56  ;;  %2662 = vmatpush1.bf16.xpose.msra.mxu0 %v2661_v50  ;;  %v472_v7 = vadd.f32 %v471_v26, %v3498_v35  ;;  %v2619_v35 = vpack.c.bf16 %v3545_v51, %v3364_v42 }
 0x108   : > { %2664 = vmatprep.subr.bf16.mxu0 %v2663_v57  ;;  %1066 = vmatmul.mubr.f32.gmra.mrb[2].mxu1 %v3405_v29  ;;  %v520_v45 = vadd.f32 %v519_v33, %v3434_v59  ;;  %v3985_v59 = vld [vmem:[#allocation23_spill] sm:$0xff] }
 0x109   : > { %1135 = vmatprep.mubr.f32.mxu1 %v3304_v54  ;;  %v473_v52 = vadd.f32 %v472_v7, %v3455_v3 }
 0x10a   : > { %1966 = vmatmul.mubr.f32.gmra.mrb[2].mxu0 %v3657_v16  ;;  %v521_v27 = vadd.f32 %v520_v45, %v3417_v37  ;;  %v3987_v37 = vpack.c.bf16 %v3985_v59, %v3986_v4 }
 0x10b   : > { %2035 = vmatprep.mubr.f32.mxu0 %v3675_v58  ;;  %v474_v29 = vadd.f32 %v473_v52, %v375_v32  ;;  %v3988_v32 = vpack.c.bf16 %v3518_v63, %v3515_v39 }
 0x10c   : > { %1136 = vmatmul.mubr.f32.vlgmr.msra.gmra.mrb[0].mxu1 %v3979_v38  ;;  %v522_v54 = vadd.f32 %v521_v27, %v3508_v47  ;;  %v2623_v38 = vpack.c.bf16 %v3590_v19, %v3991_v12 }
 0x10d   : > { %1140 = vmatprep.mubr.f32.mxu1 %v3462_v55  ;;  %2618 = vmatpush1.bf16.xpose.msra.mxu1 %v2617_v18  ;;  %v475_v3 = vadd.f32 %v474_v29, %v3542_v53  ;;  %v3989_v53 = vld [vmem:[#allocation15_spill] sm:$0xff]  ;;  %v4002_v18 = vpack.c.bf16 %v3621_v48, %v3615_v0 }
 0x10e   : > { %2036 = vmatmul.mubr.f32.vlgmr.msra.gmra.mrb[0].mxu0 %v377_v30  ;;  %2620 = vmatprep.subr.bf16.mxu1 %v2619_v35  ;;  %v523_v9 = vadd.f32 %v522_v54, %v3437_v22  ;;  %v2621_v61 = vpack.c.bf16 %v3990_v14, %v3989_v53 }
 0x10f   : > { %2040 = vmatprep.mubr.f32.mxu0 %v3663_v15  ;;  %2666 = vmatpush1.bf16.xpose.msra.mxu0 %v3987_v37  ;;  %v476_v55 = vadd.f32 %v475_v3, %v377_v30 }
 0x110   : > { %2668 = vmatprep.subr.bf16.mxu0 %v3988_v32  ;;  %1141 = vmatmul.mubr.f32.gmra.mrb[2].mxu1 %v3980_v40  ;;  %v524_v47 = vadd.f32 %v523_v9, %v3657_v16 }
 0x111   : > { %1210 = vmatprep.mubr.f32.mxu1 %v3982_v20  ;;  %v477_v41 = vadd.f32 %v476_v55, %v3675_v58  ;;  %v3993_v58 = vld [vmem:[#allocation25_spill] sm:$0xff]  ;;  %v3996_v20 = vld [vmem:[#allocation27_spill] sm:$0xff] }
 0x112   : > { %2041 = vmatmul.mubr.f32.gmra.mrb[2].mxu0 %v426_v28  ;;  %v525_v22 = vadd.f32 %v524_v47, %v3552_v56  ;;  %v3994_v30 = vpack.c.bf16 %v3992_v23, %v3993_v58  ;;  %v3997_v5 = vpack.c.bf16 %v3995_v49, %v3996_v20 }
 0x113   : > { %2110 = vmatprep.mubr.f32.mxu0 %v380_v24  ;;  %v478_v40 = vadd.f32 %v477_v41, %v3986_v4 }
 0x114   : > { %1211 = vmatmul.mubr.f32.vlgmr.msra.gmra.mrb[0].mxu1 %v3983_v31  ;;  %v526_v16 = vadd.f32 %v525_v22, %v426_v28 }
 0x115   : > { %1215 = vmatprep.mubr.f32.mxu1 %v3501_v25  ;;  %2622 = vmatpush1.bf16.xpose.msra.mxu1 %v2621_v61  ;;  %v479_v56 = vadd.f32 %v478_v40, %v380_v24  ;;  %v3999_v24 = vld [vmem:[#allocation29_spill] sm:$0xff] }
 0x116   : > { %2111 = vmatmul.mubr.f32.vlgmr.msra.gmra.mrb[0].mxu0 %v3986_v4  ;;  %2624 = vmatprep.subr.bf16.mxu1 %v2623_v38  ;;  %v527_v34 = vadd.f32 %v526_v16, %v3663_v15  ;;  %v2625_v50 = vpack.c.bf16 %v3999_v24, %v3998_v17 }
 0x117   : > { %2115 = vmatprep.mubr.f32.mxu0 %v3698_v46  ;;  %2670 = vmatpush1.bf16.xpose.msra.mxu0 %v3994_v30  ;;  %v480_v25 = vadd.f32 %v479_v56, %v3993_v58 }
 0x118   : > { %2672 = vmatprep.subr.bf16.mxu0 %v3997_v5  ;;  %1216 = vmatmul.mubr.f32.gmra.mrb[2].mxu1 %v3984_v21  ;;  %v528_v28 = vadd.f32 %v527_v34, %v3985_v59 }
 0x119   : > { %1285 = vmatprep.mubr.f32.mxu1 %v3364_v42  ;;  %v481_v15 = vadd.f32 %v480_v25, %v3515_v39  ;;  %v2627_v42 = vpack.c.bf16 %v3635_v43, %v3392_v10 }
 0x11a   : > { %2116 = vmatmul.mubr.f32.gmra.mrb[2].mxu0 %v3985_v59  ;;  %v529_v1 = vadd.f32 %v528_v28, %v3698_v46 }
 0x11b   : > { %2185 = vmatprep.mubr.f32.mxu0 %v3515_v39  ;;  %v482_v57 = vadd.f32 %v481_v15, %v3578_v6 }
 0x11c   : > { %1286 = vmatmul.mubr.f32.vlgmr.msra.gmra.mrb[0].mxu1 %v3989_v53  ;;  %v530_v26 = vadd.f32 %v529_v1, %v3992_v23 }
 0x11d   : > { %1290 = vmatprep.mubr.f32.mxu1 %v3545_v51  ;;  %2626 = vmatpush1.bf16.xpose.msra.mxu1 %v2625_v50  ;;  %v483_v39 = vadd.f32 %v482_v57, %v3996_v20  ;;  %v4000_v51 = vpack.c.bf16 %v3606_v11, %v3603_v8 }
 0x11e   : > { %2186 = vmatmul.mubr.f32.vlgmr.msra.gmra.mrb[0].mxu0 %v3993_v58  ;;  %2628 = vmatprep.subr.bf16.mxu1 %v2627_v42  ;;  %v531_v46 = vadd.f32 %v530_v26, %v3518_v63 }
 0x11f   : > { %2190 = vmatprep.mubr.f32.mxu0 %v3518_v63  ;;  %2674 = vmatpush1.bf16.xpose.msra.mxu0 %v2673_v36  ;;  %v484_v33 = vadd.f32 %v483_v39, %v3615_v0  ;;  %v4001_v36 = vld [vmem:[#allocation19_spill] sm:$0xff] }
 0x120   : > { %2676 = vmatprep.subr.bf16.mxu0 %v4000_v51  ;;  %1291 = vmatmul.mubr.f32.gmra.mrb[2].mxu1 %v3990_v14  ;;  %v532_v7 = vadd.f32 %v531_v46, %v3581_v13  ;;  %v2629_v45 = vpack.c.bf16 %v3611_v44, %v4001_v36 }
 0x121   : > { %1360 = vmatprep.mubr.f32.mxu1 %v3991_v12  ;;  %v485_v63 = vadd.f32 %v484_v33, %v3603_v8 }
 0x122   : > { %2191 = vmatmul.mubr.f32.gmra.mrb[2].mxu0 %v3992_v23  ;;  %v533_v52 = vadd.f32 %v532_v7, %v3995_v49 }
 0x123   : > { %2260 = vmatprep.mubr.f32.mxu0 %v3996_v20  ;;  %v486_v31 = vadd.f32 %v485_v63, %v3624_v60 }
 0x124   : > { %1361 = vmatmul.mubr.f32.vlgmr.msra.gmra.mrb[0].mxu1 %v3998_v17  ;;  %v534_v21 = vadd.f32 %v533_v52, %v3621_v48 }
 0x125   : > { %1365 = vmatprep.mubr.f32.mxu1 %v3590_v19  ;;  %2630 = vmatpush1.bf16.xpose.msra.mxu1 %v2629_v45 }
 0x126   : > { %2261 = vmatmul.mubr.f32.vlgmr.msra.gmra.mrb[0].mxu0 %v3578_v6  ;;  %2680 = vmatprep.subr.bf16.mxu1 %v3646_v62  ;;  %v535_v27 = vadd.f32 %v534_v21, %v3606_v11  ;;  %v438_v6 = vld [vmem:[%s3119_s30 + $0x8] sm:$0xff] }
 0x127   : > { %2265 = vmatprep.mubr.f32.mxu0 %v3995_v49  ;;  %2678 = vmatpush1.bf16.xpose.msra.mxu0 %v4002_v18 }
 0x128   : > { %487 = vadd.xlane.f32.xlu1 %v486_v31  ;;  %1366 = vmatmul.mubr.f32.gmra.mrb[2].mxu1 %v3999_v24  ;;  %v536_v19 = vadd.f32 %v535_v27, %v3627_v2 }
 0x129   : > { %1435 = vmatprep.mubr.f32.mxu1 %v3392_v10 }
 0x12a   : > { %2266 = vmatmul.mubr.f32.gmra.mrb[2].mxu0 %v3581_v13 }
 0x12b   : > { %2335 = vmatprep.mubr.f32.mxu0 %v3603_v8  ;;  %v4003_v8 = vmov 0.0  }
 0x12c   : > { %537 = vadd.xlane.f32.xlu1 %v536_v19  ;;  %1436 = vmatmul.mubr.f32.vlgmr.msra.gmra.mrb[0].mxu1 %v4001_v36  ;;  %228 = vst.msk [vmem:[%s3824_s6 + $0x8] sm:$0xff] %vm226_vm1, %v4003_v8  ;;  %227 = vst.msk [vmem:[%s3824_s6] sm:$0xff] %vm226_vm1, %v4003_v8 }
 0x12d   : > { %1440 = vmatprep.mubr.f32.mxu1 %v3635_v43  ;;  %2682 = vmatpush3.bf16.xpose.msra.mxu1 %v3646_v62 }
 0x12e   : > { %2336 = vmatmul.mubr.f32.vlgmr.msra.gmra.mrb[0].mxu0 %v3615_v0 }
 0x12f   : > { %2340 = vmatprep.mubr.f32.mxu0 %v3606_v11 }
 0x130   : > { %1441 = vmatmul.mubr.f32.gmra.mrb[2].mxu1 %v3611_v44  ;;  %v437_v44 = vld [vmem:[%s3119_s30] sm:$0xff] }
 0x131   : > { %2580 = vmatprep.mubr.f32.mxu1 %v3624_v60 }
 0x132   : > { %2341 = vmatmul.mubr.f32.gmra.mrb[2].mxu0 %v3621_v48 }
 0x133   : > { %v545_v4 = vld [vmem:[%s3824_s6 + $0x8] sm:$0xff]  ;;  %v544_v32 = vld [vmem:[%s3824_s6] sm:$0xff] }
 0x134   : > { %2581 = vmatmul.mubr.f32.vlgmr.msra.gmra.mrb[4].mxu1 %v3627_v2 }
 0x1b5   : > { %v488_v10 = vpop.xlane.xlu1 %487 }
 0x1b6   : > { %v539_v0 = vadd.f32 %v488_v10, %v437_v44 }
 0x1b8   : > { %542 = vst.msk [vmem:[%s3119_s30] sm:$0xff] %vm223_vm0, %v539_v0 }
 0x1b9   : > { %v538_v13 = vpop.xlane.xlu1 %537 }
 0x1ba   : > { %v540_v11 = vadd.f32 %v538_v13, %v438_v6 }
 0x1bc   : > { %543 = vst.msk [vmem:[%s3119_s30 + $0x8] sm:$0xff] %vm223_vm0, %v540_v11 }
 0x1ff   : > { %v1437_v48 = vpop.f32.mrb[0].mxu1 }
 0x200   : > { %v1439_v60 = vpop.f32.mrb[1].mxu1 }
 0x201   : > { %v2337_v2 = vpop.f32.mrb[0].mxu0 }
 0x202   : > { %v2683_v43 = vadd.f32 %v2337_v2, %v1437_v48  ;;  %v2339_v62 = vpop.f32.mrb[1].mxu0 }
 0x203   : > { %v1442_v35 = vpop.f32.mrb[2].mxu1 }
 0x204   : > { %v1444_v29 = vpop.f32.mrb[3].mxu1 }
 0x205   : > { %v2342_v54 = vpop.f32.mrb[2].mxu0 }
 0x206   : > { %v2684_v3 = vadd.f32 %v2342_v54, %v1442_v35  ;;  %v2344_v59 = vpop.f32.mrb[3].mxu0 }
 0x207   : > { %v2582_v37 = vpop.f32.mrb[4].mxu1 }
 0x208   : > { %v2418_v9 = vadd.f32 %v2684_v3, %v2582_v37  ;;  %v2412_v55 = vpop.f32.mrb[5].mxu1 }
 0x209   : > { %v2413_v47 = vadd.f32 %v2683_v43, %v2412_v55 }
 0x20a   : > { %v2422_v53 = vadd.f32 %v2418_v9, %v545_v4 }
 0x20b   : > { %v2421_v14 = vadd.f32 %v2413_v47, %v544_v32 }
 0x20c   : > { %2425 = vst.msk [vmem:[%s3824_s6 + $0x8] sm:$0xff] %vm226_vm1, %v2422_v53 }
 0x20d   : > { %2424 = vst.msk [vmem:[%s3824_s6] sm:$0xff] %vm226_vm1, %v2421_v14 }
 0x20e   : > { %2888 = shalt.err (!%p2885_p5)
}
 0x20f   : > { %s2889_s24 = scalar_lea.hbm %s3845_s22, 256  ;;  %s2893_s29 = scalar_lea.hbm %s3903_s3, 512 }
 0x210   : > { %p2890_p6 = scmp.ne.s32.totalorder %s3845_s22, %s2889_s24  ;;  %p2894_p2 = scmp.lt.u32.totalorder %s3845_s22, %s3903_s3 }
 0x211   : > { %p2895_p4 = scmp.lt.u32.totalorder %s2893_s29, %s2889_s24  ;;  %p2897_p8 = scmp.lt.u32.totalorder %s2889_s24, %s3845_s22 }
 0x212   : > { %p2891_p7 = pnand %p2890_p6, %p4004_p11 }
 0x213   : > { %p2896_p9 = por %p2895_p4, %p2894_p2 }
 0x214   : > { %p2892_p12 = pneg %p2891_p7 }
 0x215   : > { %p2898_p0 = por %p2897_p8, %p2896_p9 }
 0x217   : > { %p2899_p10 = pnand %p2898_p0, %p2892_p12 }
 0x219   : > { %2902 = shalt.err (!%p2899_p10)
}
 0x21a   : > { %s2966_s6 = smov 128   ;;  %s2967_s8 = smov 8  }
 0x21b   : > { %2777 = dma.vmem_to_hbm [thread:$0]  (%p4004_p11), %s3847_s11, 256, %s3845_s22, %s2432_s15, %s2966_s6, %s2966_s6, %s2967_s8  }
 0x21c PF: > { %s2471_s19 = sand.u32 1, %s2937_s12   ;;  %p4005_p13 = scmp.ne.s32.totalorder %s3949_s27, 0 }
 0x21d   : > { %p4006_p1 = scmp.ge.s32.totalorder %s2957_s17, 2  ;;  %s2472_s21 = scalar_lea.sflag [#allocation4], %s2471_s19 }
 0x21f   : > { %p2784_p3 = pnand %p4006_p1, %p4005_p13 }
 0x221   : > { %2932 = dma.done.wait (!%p2784_p3), %s2472_s21, 256  }
 0x222   : > { %2934 = vsyncadd (!%p2784_p3), %s2472_s21, 4294967040  ;;  %s20_s17 = sadd.s32 1, %s2957_s17   ;;  %s4007_s12 = smov %s2941_s13 }
 0x223   : > { %p17_p5 = scmp.ge.s32.totalorder %s20_s17, 4   ;;  %s4008_s13 = smov %s2945_s14 }
 0x224   : > { %s4009_s14 = smov %s3044_s26  ;;  %s4010_s15 = smov %s2953_s16 }
 0x225   : > { %s4011_s16 = smov %s4013_s20  ;;  %19 = sbr.rel (!%p17_p5) target bundleno = 6 (0x6), region = 89 }
 0x22c   :  { %2477 = vsyncpa [#allocation3], 1 }
 0x22d   :  { %2479 = vsyncpa [#allocation3 + $0x1], 1 }
 0x22e   :  { %2480 = vsyncpa [#allocation4], 1 }
 0x22f   :  { %2482 = vsyncpa [#allocation4 + $0x1], 1 }

</bundles_post_ra>
